<compile_context>
chip_gen: v7x
topology: tpu7x:2x2x1
jax: 0.10.0
libtpu: 0.0.40
codegen_flags: <defaults>
</compile_context>

<pallas_src>
import functools

import numpy as np
import jax
import jax.numpy as jnp
from jax.experimental import pallas as pl
from jax.experimental.pallas import tpu as pltpu

PRIMITIVES = [
    "none",
    "max_pool_3x3",
    "avg_pool_3x3",
    "skip_connect",
    "sep_conv_3x3",
    "sep_conv_5x5",
    "dil_conv_3x3",
    "dil_conv_5x5",
]

_VMEM = pl.BlockSpec(memory_space=pltpu.MemorySpace.VMEM)
_TM = 512          # row tile for the matmul kernel
_EPS = 1e-5        # BatchNorm eps (PyTorch default)


def _row_tile(rows, F, nbuf):
    """Pick a row-tile size that keeps double-buffered tiles within ~8 MiB."""
    budget = 8 * 1024 * 1024
    per_row = max(1, F * 4 * 2 * nbuf)
    cap = budget // per_row
    cap = max(8, min((cap // 8) * 8, 2048))
    return rows if rows <= cap else cap


# ----------------------------------------------------------------------------
# Pallas kernel builders (lru_cached so identical shapes reuse one kernel).
# ----------------------------------------------------------------------------
@functools.lru_cache(maxsize=None)
def _matmul_call(M, K, N, TM, relu_in, has_bias):
    """A[M,K] @ B[K,N] (+bias), fused input ReLU, bf16 MXU inputs, f32 acc."""
    grid = (pl.cdiv(M, TM),)

    def kernel(*refs):
        a_ref, b_ref = refs[0], refs[1]
        o_ref = refs[-1]
        a = a_ref[...]
        if relu_in:
            a = jnp.maximum(a, 0.0)
        acc = jnp.dot(a.astype(jnp.bfloat16), b_ref[...].astype(jnp.bfloat16),
                      preferred_element_type=jnp.float32)
        if has_bias:
            acc = acc + refs[2][...]
        o_ref[...] = acc

    in_specs = [pl.BlockSpec((TM, K), lambda i: (i, 0)),
                pl.BlockSpec((K, N), lambda i: (0, 0))]
    if has_bias:
        in_specs.append(pl.BlockSpec((1, N), lambda i: (0, 0)))
    return pl.pallas_call(
        kernel,
        out_shape=jax.ShapeDtypeStruct((M, N), jnp.float32),
        grid=grid,
        in_specs=in_specs,
        out_specs=pl.BlockSpec((TM, N), lambda i: (i, 0)),
        compiler_params=pltpu.CompilerParams(dimension_semantics=("parallel",)),
    )


def matmul_pallas(A, B, bias=None, relu_in=False):
    M, K = A.shape
    N = B.shape[1]
    TM = M if M <= _TM else _TM
    fn = _matmul_call(M, K, N, TM, bool(relu_in), bias is not None)
    args = (A, B) if bias is None else (A, B, bias)
    return fn(*args)


@functools.lru_cache(maxsize=None)
def _dw_call(Nb, s, Hph, Wph, C, k, dil, Ho, Wo, relu_in):
    """Depthwise k x k conv on stride-phase-decomposed input; strided output
    is produced directly.  One grid step per image (pipelined, parallel)."""

    def kernel(x_ref, w_ref, o_ref):
        xv = x_ref[...]                      # (s*s, Hph, Wph, C)
        if relu_in:
            xv = jnp.maximum(xv, 0.0)
        wv = w_ref[...]                      # (k, k, C)
        acc = None
        for i in range(k):
            for j in range(k):
                a, b = i * dil, j * dil
                p, ao = a % s, a // s
                q, bo = b % s, b // s
                tap = xv[p * s + q, ao:ao + Ho, bo:bo + Wo, :]
                term = tap * wv[i, j]
                acc = term if acc is None else acc + term
        o_ref[0] = acc

    return pl.pallas_call(
        kernel,
        out_shape=jax.ShapeDtypeStruct((Nb, Ho, Wo, C), jnp.float32),
        grid=(Nb,),
        in_specs=[pl.BlockSpec((s * s, Hph, Wph, C), lambda n: (n, 0, 0, 0)),
                  pl.BlockSpec((k, k, C), lambda n: (0, 0, 0))],
        out_specs=pl.BlockSpec((1, Ho, Wo, C), lambda n: (n, 0, 0, 0)),
        compiler_params=pltpu.CompilerParams(dimension_semantics=("parallel",)),
    )


@functools.lru_cache(maxsize=None)
def _pool_call(Nb, s, Hph, Wph, C, k, Ho, Wo, mode):
    """3x3 max/avg pool on stride-phase-decomposed input; avg fuses the
    count_include_pad=False reciprocal-count map."""
    is_avg = (mode == "avg")

    def kernel(*refs):
        x_ref = refs[0]
        o_ref = refs[-1]
        xv = x_ref[...]
        acc = None
        for i in range(k):
            for j in range(k):
                p, ao = i % s, i // s
                q, bo = j % s, j // s
                tap = xv[p * s + q, ao:ao + Ho, bo:bo + Wo, :]
                if acc is None:
                    acc = tap
                elif is_avg:
                    acc = acc + tap
                else:
                    acc = jnp.maximum(acc, tap)
        if is_avg:
            acc = acc * refs[1][...]         # (Ho, Wo, 1) broadcast over C
        o_ref[0] = acc

    in_specs = [pl.BlockSpec((s * s, Hph, Wph, C), lambda n: (n, 0, 0, 0))]
    if is_avg:
        in_specs.append(pl.BlockSpec((Ho, Wo, 1), lambda n: (0, 0, 0)))
    return pl.pallas_call(
        kernel,
        out_shape=jax.ShapeDtypeStruct((Nb, Ho, Wo, C), jnp.float32),
        grid=(Nb,),
        in_specs=in_specs,
        out_specs=pl.BlockSpec((1, Ho, Wo, C), lambda n: (n, 0, 0, 0)),
        compiler_params=pltpu.CompilerParams(dimension_semantics=("parallel",)),
    )


@functools.lru_cache(maxsize=None)
def _bn_stats_call(rows, F, TR):
    """Accumulate [sum, sum-of-squares] over row tiles (lane-dense F=W*C)."""
    nsteps = pl.cdiv(rows, TR)
    need_mask = (nsteps * TR != rows)

    def kernel(x_ref, o_ref):
        i = pl.program_id(0)

        @pl.when(i == 0)
        def _init():
            o_ref[...] = jnp.zeros_like(o_ref)

        x = x_ref[...]
        if need_mask:
            ridx = i * TR + jax.lax.broadcasted_iota(jnp.int32, (TR, 1), 0)
            x = jnp.where(ridx < rows, x, 0.0)
        o_ref[0:1, :] += jnp.sum(x, axis=0, keepdims=True)
        o_ref[1:2, :] += jnp.sum(x * x, axis=0, keepdims=True)

    return pl.pallas_call(
        kernel,
        out_shape=jax.ShapeDtypeStruct((2, F), jnp.float32),
        grid=(nsteps,),
        in_specs=[pl.BlockSpec((TR, F), lambda i: (i, 0))],
        out_specs=pl.BlockSpec((2, F), lambda i: (0, 0)),
        compiler_params=pltpu.CompilerParams(dimension_semantics=("arbitrary",)),
    )


@functools.lru_cache(maxsize=None)
def _scale_acc_call(n_ops, rows, F, TR, has_acc):
    """out = [acc +] sum_k x_k * a[k] + b   (per-feature a, b; lane-dense F).
    Used both for BN-normalize (n_ops=1) and the fused MixedOp weighted sum
    with deferred BatchNorms folded into a/b."""
    nsteps = pl.cdiv(rows, TR)

    def kernel(*refs):
        a_ref, b_ref = refs[0], refs[1]
        x_refs = refs[2:2 + n_ops]
        o_ref = refs[-1]
        res = x_refs[0][...] * a_ref[0:1, :]
        for t in range(1, n_ops):
            res = res + x_refs[t][...] * a_ref[t:t + 1, :]
        res = res + b_ref[...]
        if has_acc:
            res = res + refs[2 + n_ops][...]
        o_ref[...] = res

    row_spec = pl.BlockSpec((TR, F), lambda i: (i, 0))
    in_specs = ([pl.BlockSpec((n_ops, F), lambda i: (0, 0)),
                 pl.BlockSpec((1, F), lambda i: (0, 0))]
                + [row_spec] * (n_ops + (1 if has_acc else 0)))
    return pl.pallas_call(
        kernel,
        out_shape=jax.ShapeDtypeStruct((rows, F), jnp.float32),
        grid=(nsteps,),
        in_specs=in_specs,
        out_specs=row_spec,
        compiler_params=pltpu.CompilerParams(dimension_semantics=("parallel",)),
    )


@functools.lru_cache(maxsize=None)
def _softmax_mask_call(K, NOPS):
    def kernel(a_ref, m_ref, o_ref):
        a = a_ref[...]
        e = jnp.exp(a - jnp.max(a, axis=1, keepdims=True)) * m_ref[...]
        o_ref[...] = e / jnp.sum(e, axis=1, keepdims=True)

    return pl.pallas_call(
        kernel,
        out_shape=jax.ShapeDtypeStruct((K, NOPS), jnp.float32),
        in_specs=[_VMEM, _VMEM],
        out_specs=_VMEM,
    )


@functools.lru_cache(maxsize=None)
def _gap_call(N, HW, C):
    def kernel(x_ref, o_ref):
        o_ref[...] = jnp.mean(x_ref[...], axis=1)

    return pl.pallas_call(
        kernel,
        out_shape=jax.ShapeDtypeStruct((N, C), jnp.float32),
        in_specs=[_VMEM],
        out_specs=_VMEM,
    )


# ----------------------------------------------------------------------------
# Wrappers
# ----------------------------------------------------------------------------
def _to_phases(xp, s, cval):
    """Split padded NHWC input into the s*s stride phases:
       phases[n*s*s + p*s + q, a, b, :] == xp[n, s*a + p, s*b + q, :]."""
    N, Hp, Wp, C = xp.shape
    if s == 1:
        return xp, Hp, Wp
    hpad, wpad = (-Hp) % s, (-Wp) % s
    if hpad or wpad:
        xp = jnp.pad(xp, ((0, 0), (0, hpad), (0, wpad), (0, 0)),
                     constant_values=cval)
    Hph, Wph = (Hp + hpad) // s, (Wp + wpad) // s
    ph = xp.reshape(N, Hph, s, Wph, s, C).transpose(0, 2, 4, 1, 3, 5)
    return ph.reshape(N * s * s, Hph, Wph, C), Hph, Wph


def depthwise_conv(x, w, stride, padding, dilation, relu_in=False):
    N, H, W, C = x.shape
    k = w.shape[0]
    xp = jnp.pad(x, ((0, 0), (padding, padding), (padding, padding), (0, 0)))
    Hp, Wp = H + 2 * padding, W + 2 * padding
    Ho = (Hp - dilation * (k - 1) - 1) // stride + 1
    Wo = (Wp - dilation * (k - 1) - 1) // stride + 1
    ph, Hph, Wph = _to_phases(xp, stride, 0.0)
    return _dw_call(N, stride, Hph, Wph, C, k, dilation, Ho, Wo,
                    bool(relu_in))(ph, w)


def window_pool(x, stride, mode, k=3, pad=1):
    """max_pool_3x3 / avg_pool_3x3 (count_include_pad=False), padding=1."""
    N, H, W, C = x.shape
    cval = float("-inf") if mode == "max" else 0.0
    xp = jnp.pad(x, ((0, 0), (pad, pad), (pad, pad), (0, 0)),
                 constant_values=cval)
    Hp, Wp = H + 2 * pad, W + 2 * pad
    Ho = (Hp - k) // stride + 1
    Wo = (Wp - k) // stride + 1
    ph, Hph, Wph = _to_phases(xp, stride, cval)
    if mode == "avg":
        ones = np.pad(np.ones((H, W), np.float32), pad)
        Hf, Wf = Hp - k + 1, Wp - k + 1
        cnt = np.zeros((Hf, Wf), np.float32)
        for i in range(k):
            for j in range(k):
                cnt += ones[i:i + Hf, j:j + Wf]
        recip = (1.0 / cnt[::stride, ::stride][:Ho, :Wo]).astype(np.float32)
        recip = recip[:, :, None]                       # (Ho, Wo, 1)
        return _pool_call(N, stride, Hph, Wph, C, k, Ho, Wo, "avg")(
            ph, jnp.asarray(recip))
    return _pool_call(N, stride, Hph, Wph, C, k, Ho, Wo, "max")(ph)


def scale_accumulate(xs, a_stack, b_row, acc=None):
    rows, F = xs[0].shape
    n = len(xs)
    nbuf = n + 1 + (1 if acc is not None else 0)
    TR = _row_tile(rows, F, nbuf)
    fn = _scale_acc_call(n, rows, F, TR, acc is not None)
    args = [a_stack, b_row] + list(xs) + ([acc] if acc is not None else [])
    return fn(*args)


def bn_stats(x):
    """Per-channel [sum, sumsq] over N,H,W (lane-dense accumulation)."""
    N, H, W, C = x.shape
    rows, F = N * H, W * C
    TR = _row_tile(rows, F, 2)
    st = _bn_stats_call(rows, F, TR)(x.reshape(rows, F))
    return st.reshape(2, W, C).sum(axis=1), float(N * H * W)


def bn_scale_shift(stats, count, gamma=None, beta=None):
    mean = stats[0] / count
    var = jnp.maximum(stats[1] / count - mean * mean, 0.0)
    inv = jax.lax.rsqrt(var + _EPS)
    if gamma is not None:
        inv = inv * gamma
    shift = (-mean) * inv
    if beta is not None:
        shift = shift + beta
    return inv, shift                         # (C,), (C,)


def batchnorm(x, gamma=None, beta=None):
    """Training-mode BatchNorm2d over NHWC (biased variance, eps=1e-5)."""
    N, H, W, C = x.shape
    stats, cnt = bn_stats(x)
    a_c, b_c = bn_scale_shift(stats, cnt, gamma, beta)
    aF = jnp.tile(a_c, W)[None, :]
    bF = jnp.tile(b_c, W)[None, :]
    y = scale_accumulate([x.reshape(N * H, W * C)], aF, bF)
    return y.reshape(N, H, W, C)


def softmax_with_mask(alphas, mask):
    if alphas.shape != mask.shape:
        raise ValueError("alphas and mask must have the same shape")
    K, NOPS = alphas.shape
    return _softmax_mask_call(K, NOPS)(alphas, mask)


def global_avg_pool(x):
    N, H, W, C = x.shape
    return _gap_call(N, H * W, C)(x.reshape(N, H * W, C))


# ----------------------------------------------------------------------------
# Conv helpers built on the Pallas matmul kernel
# ----------------------------------------------------------------------------
def conv1x1(x, w, relu_in=False):
    N, H, W, Cin = x.shape
    Cout = w.shape[3]
    out = matmul_pallas(x.reshape(N * H * W, Cin), w.reshape(Cin, Cout),
                        relu_in=relu_in)
    return out.reshape(N, H, W, Cout)


def conv2d_im2col(x, w, stride=1, padding=0, relu_in=False):
    """Dense conv via im2col + Pallas matmul (used by the stem)."""
    kh, kw, Cin, Cout = w.shape
    N, H, W, _ = x.shape
    xp = jnp.pad(x, ((0, 0), (padding, padding), (padding, padding), (0, 0)))
    Ho = (H + 2 * padding - kh) // stride + 1
    Wo = (W + 2 * padding - kw) // stride + 1
    cols = []
    for i in range(kh):
        for j in range(kw):
            cols.append(xp[:, i:i + (Ho - 1) * stride + 1:stride,
                           j:j + (Wo - 1) * stride + 1:stride, :])
    A = jnp.concatenate(cols, axis=-1).reshape(N * Ho * Wo, kh * kw * Cin)
    B = w.reshape(kh * kw * Cin, Cout)
    out = matmul_pallas(A, B, relu_in=relu_in)
    return out.reshape(N, Ho, Wo, Cout)


# ----------------------------------------------------------------------------
# DARTS building blocks (forward)
# ----------------------------------------------------------------------------
def relu_conv_bn_1x1(x, w):
    return batchnorm(conv1x1(x, w, relu_in=True))


def factorized_reduce(x, w1, w2, defer_bn=False):
    x1 = x[:, ::2, ::2, :]
    x2 = x[:, 1::2, 1::2, :]
    o1 = conv1x1(x1, w1, relu_in=True)
    o2 = conv1x1(x2, w2, relu_in=True)
    h = jnp.concatenate([o1, o2], axis=-1)
    if defer_bn:
        return h, bn_stats(h)
    return batchnorm(h)


def sep_conv(x, p, k, stride):
    pad = (k - 1) // 2
    h = depthwise_conv(x, p["dw1"], stride, pad, 1, relu_in=True)
    h = conv1x1(h, p["pw1"])
    h = batchnorm(h)                                   # internal BN
    h = depthwise_conv(h, p["dw2"], 1, pad, 1, relu_in=True)
    h = conv1x1(h, p["pw2"])
    return h, bn_stats(h)                              # final BN deferred


def dil_conv(x, p, k, stride):
    pad = 2 if k == 3 else 4
    h = depthwise_conv(x, p["dw"], stride, pad, 2, relu_in=True)
    h = conv1x1(h, p["pw"])
    return h, bn_stats(h)                              # final BN deferred


def mixed_op(x, weights_row, stride, p, acc=None):
    """Weighted sum of the 7 non-'none' primitives with their trailing
    (affine-free) BatchNorms folded into per-feature scale/shift; accumulates
    onto `acc` (previous edges of the same node) in the same kernel."""
    branches = []                                      # (weight idx, tensor, stats)
    for idx, prim in enumerate(PRIMITIVES):
        if prim == "none":
            continue                                   # exact zero contribution
        if prim == "max_pool_3x3":
            t = window_pool(x, stride, "max")
            st = bn_stats(t)
        elif prim == "avg_pool_3x3":
            t = window_pool(x, stride, "avg")
            st = bn_stats(t)
        elif prim == "skip_connect":
            if stride == 1:
                t, st = x, None
            else:
                t, st = factorized_reduce(x, p["fr"]["w1"], p["fr"]["w2"],
                                          defer_bn=True)
        elif prim == "sep_conv_3x3":
            t, st = sep_conv(x, p["sep3"], 3, stride)
        elif prim == "sep_conv_5x5":
            t, st = sep_conv(x, p["sep5"], 5, stride)
        elif prim == "dil_conv_3x3":
            t, st = dil_conv(x, p["dil3"], 3, stride)
        elif prim == "dil_conv_5x5":
            t, st = dil_conv(x, p["dil5"], 5, stride)
        branches.append((idx, t, st))

    N, Ho, Wo, C = branches[0][1].shape
    rows, F = N * Ho, Wo * C
    xs, a_rows = [], []
    b_total = jnp.zeros((F,), jnp.float32)
    for idx, t, st in branches:
        wk = weights_row[idx]
        if st is None:
            a_rows.append(jnp.broadcast_to(wk, (F,)))
        else:
            stats, cnt = st
            a_c, b_c = bn_scale_shift(stats, cnt)      # affine=False
            a_rows.append(wk * jnp.tile(a_c, Wo))
            b_total = b_total + wk * jnp.tile(b_c, Wo)
        xs.append(t.reshape(rows, F))
    out2d = scale_accumulate(xs, jnp.stack(a_rows, axis=0),
                             b_total[None, :], acc=acc)
    return out2d, (N, Ho, Wo, C)


def cell_forward(cell, s0, s1, weights):
    if cell["pre0"]["type"] == "fr":
        s0 = factorized_reduce(s0, cell["pre0"]["w1"], cell["pre0"]["w2"])
    else:
        s0 = relu_conv_bn_1x1(s0, cell["pre0"]["w"])
    s1 = relu_conv_bn_1x1(s1, cell["pre1"]["w"])
    states = [s0, s1]
    offset = 0
    for _ in range(cell["steps"]):
        acc2d, shape4 = None, None
        for j, h in enumerate(states):
            edge = cell["ops"][offset + j]
            acc2d, shape4 = mixed_op(h, weights[offset + j], edge["stride"],
                                     edge["params"], acc=acc2d)
        offset += len(states)
        states.append(acc2d.reshape(shape4))
    return jnp.concatenate(states[-cell["multiplier"]:], axis=-1)


def network_forward(net, x_nhwc):
    s = conv2d_im2col(x_nhwc, net["stem_w"], stride=1, padding=1)
    s = batchnorm(s, net["stem_bn_g"], net["stem_bn_b"])
    s0 = s1 = s
    w_normal = softmax_with_mask(net["alphas_normal"], net["mask_normal"])
    w_reduce = softmax_with_mask(net["alphas_reduce"], net["mask_reduce"])
    for cell in net["cells"]:
        w = w_reduce if cell["reduction"] else w_normal
        s0, s1 = s1, cell_forward(cell, s0, s1, w)
    pooled = global_avg_pool(s1)                       # AdaptiveAvgPool2d(1)
    logits = matmul_pallas(pooled, net["cls_w"], bias=net["cls_b"][None, :])
    return logits


# ----------------------------------------------------------------------------
# Deterministic parameter initialization (shapes follow Network.__init__)
# ----------------------------------------------------------------------------
class KeyGen:
    def __init__(self, key):
        self._key = key

    def __call__(self):
        self._key, sub = jax.random.split(self._key)
        return sub


def _conv_w(kg, kh, kw, cin, cout):
    scale = 1.0 / np.sqrt(kh * kw * cin)
    return jax.random.normal(kg(), (kh, kw, cin, cout), jnp.float32) * scale


def _dw_w(kg, k, c):
    return jax.random.normal(kg(), (k, k, c), jnp.float32) * (1.0 / k)


def _init_mixed_op(kg, C, stride):
    p = {}
    if stride != 1:
        p["fr"] = {"w1": _conv_w(kg, 1, 1, C, C // 2),
                   "w2": _conv_w(kg, 1, 1, C, C // 2)}
    p["sep3"] = {"dw1": _dw_w(kg, 3, C), "pw1": _conv_w(kg, 1, 1, C, C),
                 "dw2": _dw_w(kg, 3, C), "pw2": _conv_w(kg, 1, 1, C, C)}
    p["sep5"] = {"dw1": _dw_w(kg, 5, C), "pw1": _conv_w(kg, 1, 1, C, C),
                 "dw2": _dw_w(kg, 5, C), "pw2": _conv_w(kg, 1, 1, C, C)}
    p["dil3"] = {"dw": _dw_w(kg, 3, C), "pw": _conv_w(kg, 1, 1, C, C)}
    p["dil5"] = {"dw": _dw_w(kg, 5, C), "pw": _conv_w(kg, 1, 1, C, C)}
    return p


def _init_cell(kg, steps, multiplier, Cpp, Cp, C, reduction, reduction_prev):
    cell = {"reduction": reduction, "steps": steps, "multiplier": multiplier}
    if reduction_prev:
        cell["pre0"] = {"type": "fr",
                        "w1": _conv_w(kg, 1, 1, Cpp, C // 2),
                        "w2": _conv_w(kg, 1, 1, Cpp, C // 2)}
    else:
        cell["pre0"] = {"type": "rcb", "w": _conv_w(kg, 1, 1, Cpp, C)}
    cell["pre1"] = {"type": "rcb", "w": _conv_w(kg, 1, 1, Cp, C)}
    ops = []
    for i in range(steps):
        for j in range(2 + i):
            stride = 2 if reduction and j < 2 else 1
            ops.append({"stride": stride, "params": _init_mixed_op(kg, C, stride)})
    cell["ops"] = ops
    return cell


def init_network(kg, C, num_classes, layers, steps, multiplier, stem_multiplier):
    net = {}
    C_curr = stem_multiplier * C
    net["stem_w"] = _conv_w(kg, 3, 3, 3, C_curr)
    net["stem_bn_g"] = jnp.ones((C_curr,), jnp.float32)
    net["stem_bn_b"] = jnp.zeros((C_curr,), jnp.float32)
    reduce_idx = [layers // 3, 2 * layers // 3]
    Cpp, Cp, Cc = C_curr, C_curr, C
    cells = []
    red_prev = False
    for i in range(layers):
        if i in reduce_idx:
            Cc *= 2
            red = True
        else:
            red = False
        cells.append(_init_cell(kg, steps, multiplier, Cpp, Cp, Cc, red, red_prev))
        red_prev = red
        Cpp, Cp = Cp, multiplier * Cc
    net["cells"] = cells
    net["cls_w"] = jax.random.normal(kg(), (Cp, num_classes), jnp.float32) / np.sqrt(Cp)
    net["cls_b"] = jnp.zeros((num_classes,), jnp.float32)
    k_edges = sum(1 for i in range(steps) for _ in range(2 + i))
    num_ops = len(PRIMITIVES)
    net["alphas_normal"] = 0.001 * jax.random.normal(kg(), (k_edges, num_ops), jnp.float32)
    net["alphas_reduce"] = 0.001 * jax.random.normal(kg(), (k_edges, num_ops), jnp.float32)
    net["mask_normal"] = jnp.ones((k_edges, num_ops), jnp.float32)
    net["mask_reduce"] = jnp.ones((k_edges, num_ops), jnp.float32)
    return net


# ----------------------------------------------------------------------------
if __name__ == "__main__":
    key = jax.random.PRNGKey(0)
    k_x, k_p = jax.random.split(key)

    # Small but structurally faithful config (defaults are C=16, layers=5,
    # steps=4, multiplier=4); kept small so the synthetic forward runs fast.
    C, num_classes, layers, steps, multiplier, stem_mult = 4, 10, 3, 2, 2, 3
    N, H, W = 2, 16, 16

    x_nchw = jax.random.normal(k_x, (N, 3, H, W), jnp.float32)  # PyTorch NCHW
    net = init_network(KeyGen(k_p), C, num_classes, layers, steps, multiplier,
                       stem_mult)

    x_nhwc = jnp.transpose(x_nchw, (0, 2, 3, 1))
    logits = network_forward(net, x_nhwc)
    logits = jax.block_until_ready(logits)

    assert logits.shape == (N, num_classes), logits.shape
    assert bool(jnp.all(jnp.isfinite(logits)))
    print("KERNEL_OK")
</pallas_src>

<mosaic_0001>
module attributes {stable_mosaic.version = 11 : i64} {
  func.func @kernel(%arg0: i32, %arg1: memref<512x27xf32, #tpu.memory_space<vmem>>, %arg2: memref<27x12xf32, #tpu.memory_space<vmem>>, %arg3: memref<512x12xf32, #tpu.memory_space<vmem>>) attributes {dimension_semantics = [#tpu.dimension_semantics<parallel>], iteration_bounds = array<i64: 1>, scalar_prefetch = 0 : i64, scratch_operands = 0 : i64, tpu.core_type = #tpu.core_type<tc>, window_params = [{transform_indices = @transform_0, window_bounds = array<i64: 512, 27>}, {pipeline_mode = #tpu.pipeline_mode<synchronous>, transform_indices = @transform_1, window_bounds = array<i64: 27, 12>}, {transform_indices = @transform_2, window_bounds = array<i64: 512, 12>}]} {
    %c0 = arith.constant 0 : index
    %c0_0 = arith.constant 0 : index
    %0 = vector.load %arg1[%c0, %c0_0] : memref<512x27xf32, #tpu.memory_space<vmem>>, vector<512x27xf32>
    %1 = arith.truncf %0 : vector<512x27xf32> to vector<512x27xbf16>
    %c0_1 = arith.constant 0 : index
    %c0_2 = arith.constant 0 : index
    %2 = vector.load %arg2[%c0_1, %c0_2] : memref<27x12xf32, #tpu.memory_space<vmem>>, vector<27x12xf32>
    %3 = arith.truncf %2 : vector<27x12xf32> to vector<27x12xbf16>
    %cst = arith.constant dense<0.000000e+00> : vector<512x12xf32>
    %4 = tpu.matmul %1, %3, %cst {dimension_numbers = #tpu.dot_dimension_numbers<[1], [0], [0], [1], [0, 0, 1, 1], [], []>} : vector<512x27xbf16>, vector<27x12xbf16>, vector<512x12xf32> -> vector<512x12xf32>
    %c0_3 = arith.constant 0 : index
    %c0_4 = arith.constant 0 : index
    %5 = vector.load %arg3[%c0_3, %c0_4] : memref<512x12xf32, #tpu.memory_space<vmem>>, vector<512x12xf32>
    tpu.vector_store %arg3[%c0_3, %c0_4], %4 {strides = array<i32>} : memref<512x12xf32, #tpu.memory_space<vmem>>, vector<512x12xf32>,
    return
  }
  func.func @transform_0(%arg0: i32) -> (i32, i32) {
    %c0_i32 = arith.constant 0 : i32
    %c0_i32_0 = arith.constant 0 : i32
    return %arg0, %c0_i32 : i32, i32
  }
  func.func @transform_1(%arg0: i32) -> (i32, i32) {
    %c0_i32 = arith.constant 0 : i32
    %c0_i32_0 = arith.constant 0 : i32
    %c0_i32_1 = arith.constant 0 : i32
    return %c0_i32, %c0_i32_0 : i32, i32
  }
  func.func @transform_2(%arg0: i32) -> (i32, i32) {
    %c0_i32 = arith.constant 0 : i32
    %c0_i32_0 = arith.constant 0 : i32
    return %arg0, %c0_i32 : i32, i32
  }
}

</mosaic_0001>

<bundles_post_ra>
// kernel: tpu_custom_call.1
= control target key start
LH: loop header
LB: loop body
LE: loop exit
PB: predicated region body
PF: predicated region fallthrough
CT: control target
= control target key end

     0   :  { %vm211_vm0 = vcmask 1044480   ;;  %vm212_vm1 = vcmask 1045504   ;;  %v715_v3 = vmov 65535   ;;  %vm114_vm2 = vcmask 220160   ;;  %s1223_s1 = inlined_call_operand.vmem [shape: f32[27,12], index: 1, kind: input, shape index: {}]   ;;  %s1224_s0 = inlined_call_operand.vmem [shape: f32[512,27], index: 0, kind: input, shape index: {}]   ;;  %s1225_s2 = inlined_call_operand.vmem [shape: f32[512,12], index: 2, kind: output, shape index: {}]  }
   0x1   :  { %v108_v0 = vld [vmem:[%s1223_s1] sm:$0xff]  ;;  %v109_v1 = vld [vmem:[%s1223_s1 + $0x8] sm:$0xff]  ;;  %v110_v2 = vld [vmem:[%s1223_s1 + $0x10] sm:$0xff]  ;;  %v213_v4 = vsel %vm211_vm0, 4294967295, %v715_v3  ;;  %vm507_vm3 = vcmask 97280  }
   0x2   :  { %v112_v5 = vpack.c.bf16 %v109_v1, %v108_v0  ;;  %v111_v6 = vld [vmem:[%s1223_s1 + $0x18] sm:$0x7]  ;;  %v214_v7 = vsel %vm212_vm1, %v213_v4, 0  ;;  %v12_v8 = vld [vmem:[%s1224_s0] sm:$0xff]  ;;  %v13_v9 = vld [vmem:[%s1224_s0 + $0x8] sm:$0xff] }
   0x3   :  { %v113_v10 = vpack.c.bf16 %v111_v6, %v110_v2  ;;  %v76_v11 = vpack.c.bf16 %v13_v9, %v12_v8  ;;  %v44_v12 = vld [vmem:[%s1224_s0 + $0x100] sm:$0xff]  ;;  %v45_v13 = vld [vmem:[%s1224_s0 + $0x108] sm:$0xff]  ;;  %v14_v15 = vld [vmem:[%s1224_s0 + $0x10] sm:$0xff] }
   0x4   :  { %642 = vmatprep.subr.bf16.mxu0 %v112_v5  ;;  %710 = vmatprep.subr.bf16.mxu1 %v112_v5  ;;  %v92_v14 = vpack.c.bf16 %v45_v13, %v44_v12  ;;  %v15_v16 = vld [vmem:[%s1224_s0 + $0x18] sm:$0xff]  ;;  %v46_v18 = vld [vmem:[%s1224_s0 + $0x110] sm:$0xff]  ;;  %v16_v20 = vld [vmem:[%s1224_s0 + $0x20] sm:$0xff] }
   0x5   :  { %643 = vmatpush3.bf16.msra.mxu0 %v112_v5  ;;  %712 = vmatpush3.bf16.msra.mxu1 %v112_v5  ;;  %v216_v17 = vand.u32 %v214_v7, %v113_v10  ;;  %v47_v19 = vld [vmem:[%s1224_s0 + $0x118] sm:$0xff]  ;;  %v17_v21 = vld [vmem:[%s1224_s0 + $0x28] sm:$0xff]  ;;  %v48_v22 = vld [vmem:[%s1224_s0 + $0x120] sm:$0xff]  ;;  %v77_v24 = vpack.c.bf16 %v15_v16, %v14_v15 }
   0x6   :  { %646 = vmatprep.mubr.msk.bf16.mxu0 %vm114_vm2, %v76_v11  ;;  %678 = vmatprep.mubr.msk.bf16.mxu1 %vm114_vm2, %v92_v14  ;;  %v49_v23 = vld [vmem:[%s1224_s0 + $0x128] sm:$0xff]  ;;  %v93_v25 = vpack.c.bf16 %v47_v19, %v46_v18  ;;  %v78_v26 = vpack.c.bf16 %v17_v21, %v16_v20  ;;  %v18_v28 = vld [vmem:[%s1224_s0 + $0x30] sm:$0xff]  ;;  %v19_v29 = vld [vmem:[%s1224_s0 + $0x38] sm:$0xff] }
   0x7   :  { %644 = vmatprep.subr.bf16.mxu0 %v216_v17  ;;  %711 = vmatprep.subr.bf16.mxu1 %v216_v17  ;;  %v94_v27 = vpack.c.bf16 %v49_v23, %v48_v22  ;;  %v50_v30 = vld [vmem:[%s1224_s0 + $0x130] sm:$0xff]  ;;  %v51_v31 = vld [vmem:[%s1224_s0 + $0x138] sm:$0xff]  ;;  %v20_v32 = vld [vmem:[%s1224_s0 + $0x40] sm:$0xff]  ;;  %v79_v36 = vpack.c.bf16 %v19_v29, %v18_v28 }
   0x8   :  { %v21_v33 = vld [vmem:[%s1224_s0 + $0x48] sm:$0xff]  ;;  %v52_v34 = vld [vmem:[%s1224_s0 + $0x140] sm:$0xff]  ;;  %v95_v37 = vpack.c.bf16 %v51_v31, %v50_v30  ;;  %v22_v40 = vld [vmem:[%s1224_s0 + $0x50] sm:$0xff] }
   0x9   :  { %645 = vmatpush3.bf16.msra.mxu0 %v216_v17  ;;  %713 = vmatpush3.bf16.msra.mxu1 %v216_v17  ;;  %v53_v35 = vld [vmem:[%s1224_s0 + $0x148] sm:$0xff]  ;;  %v80_v38 = vpack.c.bf16 %v21_v33, %v20_v32  ;;  %v23_v41 = vld [vmem:[%s1224_s0 + $0x58] sm:$0xff]  ;;  %v54_v42 = vld [vmem:[%s1224_s0 + $0x150] sm:$0xff] }
   0xa   :  { %v96_v39 = vpack.c.bf16 %v53_v35, %v52_v34  ;;  %v55_v43 = vld [vmem:[%s1224_s0 + $0x158] sm:$0xff]  ;;  %v24_v44 = vld [vmem:[%s1224_s0 + $0x60] sm:$0xff]  ;;  %v25_v45 = vld [vmem:[%s1224_s0 + $0x68] sm:$0xff]  ;;  %v81_v48 = vpack.c.bf16 %v23_v41, %v22_v40 }
   0xb   :  { %v56_v46 = vld [vmem:[%s1224_s0 + $0x160] sm:$0xff]  ;;  %v57_v47 = vld [vmem:[%s1224_s0 + $0x168] sm:$0xff]  ;;  %v97_v49 = vpack.c.bf16 %v55_v43, %v54_v42  ;;  %v82_v50 = vpack.c.bf16 %v25_v45, %v24_v44  ;;  %v26_v52 = vld [vmem:[%s1224_s0 + $0x70] sm:$0xff] }
   0xc   :  { %647 = vmatmul.mubr.msk.bf16.vlgmr.msra.gmra.mrb[0].mxu0 %vm114_vm2, %v77_v24  ;;  %679 = vmatmul.mubr.msk.bf16.vlgmr.msra.gmra.mrb[0].mxu1 %vm114_vm2, %v93_v25  ;;  %v98_v51 = vpack.c.bf16 %v57_v47, %v56_v46  ;;  %v27_v53 = vld [vmem:[%s1224_s0 + $0x78] sm:$0xff]  ;;  %v58_v54 = vld [vmem:[%s1224_s0 + $0x170] sm:$0xff]  ;;  %v28_v56 = vld [vmem:[%s1224_s0 + $0x80] sm:$0xff] }
   0xd   :  { %650 = vmatprep.mubr.msk.bf16.mxu0 %vm114_vm2, %v78_v26  ;;  %682 = vmatprep.mubr.msk.bf16.mxu1 %vm114_vm2, %v94_v27  ;;  %v59_v55 = vld [vmem:[%s1224_s0 + $0x178] sm:$0xff]  ;;  %v29_v57 = vld [vmem:[%s1224_s0 + $0x88] sm:$0xff]  ;;  %v60_v58 = vld [vmem:[%s1224_s0 + $0x180] sm:$0xff]  ;;  %v83_v60 = vpack.c.bf16 %v27_v53, %v26_v52 }
   0xe   :  { %v61_v59 = vld [vmem:[%s1224_s0 + $0x188] sm:$0xff]  ;;  %v99_v61 = vpack.c.bf16 %v59_v55, %v58_v54  ;;  %v84_v62 = vpack.c.bf16 %v29_v57, %v28_v56  ;;  %v30_v0 = vld [vmem:[%s1224_s0 + $0x90] sm:$0xff]  ;;  %v31_v1 = vld [vmem:[%s1224_s0 + $0x98] sm:$0xff] }
   0xf   :  { %v100_v63 = vpack.c.bf16 %v61_v59, %v60_v58  ;;  %v62_v2 = vld [vmem:[%s1224_s0 + $0x190] sm:$0xff]  ;;  %v63_v3 = vld [vmem:[%s1224_s0 + $0x198] sm:$0xff]  ;;  %v32_v4 = vld [vmem:[%s1224_s0 + $0xa0] sm:$0xff]  ;;  %v85_v8 = vpack.c.bf16 %v31_v1, %v30_v0 }
  0x10   :  { %v33_v5 = vld [vmem:[%s1224_s0 + $0xa8] sm:$0xff]  ;;  %v64_v6 = vld [vmem:[%s1224_s0 + $0x1a0] sm:$0xff]  ;;  %v101_v9 = vpack.c.bf16 %v63_v3, %v62_v2  ;;  %v34_v12 = vld [vmem:[%s1224_s0 + $0xb0] sm:$0xff] }
  0x11   :  { %v65_v7 = vld [vmem:[%s1224_s0 + $0x1a8] sm:$0xff]  ;;  %v86_v10 = vpack.c.bf16 %v33_v5, %v32_v4  ;;  %v35_v13 = vld [vmem:[%s1224_s0 + $0xb8] sm:$0xff]  ;;  %v66_v14 = vld [vmem:[%s1224_s0 + $0x1b0] sm:$0xff] }
  0x12   :  { %v102_v11 = vpack.c.bf16 %v65_v7, %v64_v6  ;;  %v67_v15 = vld [vmem:[%s1224_s0 + $0x1b8] sm:$0xff]  ;;  %v36_v16 = vld [vmem:[%s1224_s0 + $0xc0] sm:$0xff]  ;;  %v37_v17 = vld [vmem:[%s1224_s0 + $0xc8] sm:$0xff]  ;;  %v87_v20 = vpack.c.bf16 %v35_v13, %v34_v12 }
  0x13   :  { %v68_v18 = vld [vmem:[%s1224_s0 + $0x1c0] sm:$0xff]  ;;  %v69_v19 = vld [vmem:[%s1224_s0 + $0x1c8] sm:$0xff]  ;;  %v103_v21 = vpack.c.bf16 %v67_v15, %v66_v14  ;;  %v88_v22 = vpack.c.bf16 %v37_v17, %v36_v16  ;;  %v38_v24 = vld [vmem:[%s1224_s0 + $0xd0] sm:$0xff] }
  0x14   :  { %651 = vmatmul.mubr.msk.bf16.gmra.mrb[4].mxu0 %vm114_vm2, %v79_v36  ;;  %683 = vmatmul.mubr.msk.bf16.gmra.mrb[4].mxu1 %vm114_vm2, %v95_v37  ;;  %v104_v23 = vpack.c.bf16 %v69_v19, %v68_v18  ;;  %v39_v25 = vld [vmem:[%s1224_s0 + $0xd8] sm:$0xff]  ;;  %v70_v26 = vld [vmem:[%s1224_s0 + $0x1d0] sm:$0xff]  ;;  %v40_v28 = vld [vmem:[%s1224_s0 + $0xe0] sm:$0xff] }
  0x15   :  { %654 = vmatprep.mubr.msk.bf16.mxu0 %vm114_vm2, %v80_v38  ;;  %686 = vmatprep.mubr.msk.bf16.mxu1 %vm114_vm2, %v96_v39  ;;  %v71_v27 = vld [vmem:[%s1224_s0 + $0x1d8] sm:$0xff]  ;;  %v41_v29 = vld [vmem:[%s1224_s0 + $0xe8] sm:$0xff]  ;;  %v72_v30 = vld [vmem:[%s1224_s0 + $0x1e0] sm:$0xff]  ;;  %v89_v32 = vpack.c.bf16 %v39_v25, %v38_v24 }
  0x16   :  { %v73_v31 = vld [vmem:[%s1224_s0 + $0x1e8] sm:$0xff]  ;;  %v105_v33 = vpack.c.bf16 %v71_v27, %v70_v26  ;;  %v90_v34 = vpack.c.bf16 %v41_v29, %v40_v28  ;;  %v42_v36 = vld [vmem:[%s1224_s0 + $0xf0] sm:$0xff]  ;;  %v43_v37 = vld [vmem:[%s1224_s0 + $0xf8] sm:$0xff] }
  0x17   :  { %v106_v35 = vpack.c.bf16 %v73_v31, %v72_v30  ;;  %v74_v38 = vld [vmem:[%s1224_s0 + $0x1f0] sm:$0xff]  ;;  %v75_v39 = vld [vmem:[%s1224_s0 + $0x1f8] sm:$0xff]  ;;  %v91_v40 = vpack.c.bf16 %v43_v37, %v42_v36 }
  0x18   :  { %v107_v41 = vpack.c.bf16 %v75_v39, %v74_v38 }
  0x1c   :  { %655 = vmatmul.mubr.msk.bf16.gmra.mrb[8].mxu0 %vm114_vm2, %v81_v48  ;;  %687 = vmatmul.mubr.msk.bf16.gmra.mrb[8].mxu1 %vm114_vm2, %v97_v49 }
  0x1d   :  { %658 = vmatprep.mubr.msk.bf16.mxu0 %vm114_vm2, %v82_v50  ;;  %690 = vmatprep.mubr.msk.bf16.mxu1 %vm114_vm2, %v98_v51 }
  0x24   :  { %659 = vmatmul.mubr.msk.bf16.gmra.mrb[12].mxu0 %vm114_vm2, %v83_v60  ;;  %691 = vmatmul.mubr.msk.bf16.gmra.mrb[12].mxu1 %vm114_vm2, %v99_v61 }
  0x25   :  { %662 = vmatprep.mubr.msk.bf16.mxu0 %vm114_vm2, %v84_v62  ;;  %694 = vmatprep.mubr.msk.bf16.mxu1 %vm114_vm2, %v100_v63 }
  0x2c   :  { %663 = vmatmul.mubr.msk.bf16.gmra.mrb[16].mxu0 %vm114_vm2, %v85_v8  ;;  %695 = vmatmul.mubr.msk.bf16.gmra.mrb[16].mxu1 %vm114_vm2, %v101_v9 }
  0x2d   :  { %666 = vmatprep.mubr.msk.bf16.mxu0 %vm114_vm2, %v86_v10  ;;  %698 = vmatprep.mubr.msk.bf16.mxu1 %vm114_vm2, %v102_v11 }
  0x34   :  { %667 = vmatmul.mubr.msk.bf16.gmra.mrb[20].mxu0 %vm114_vm2, %v87_v20  ;;  %699 = vmatmul.mubr.msk.bf16.gmra.mrb[20].mxu1 %vm114_vm2, %v103_v21 }
  0x35   :  { %670 = vmatprep.mubr.msk.bf16.mxu0 %vm114_vm2, %v88_v22  ;;  %702 = vmatprep.mubr.msk.bf16.mxu1 %vm114_vm2, %v104_v23 }
  0x3c   :  { %671 = vmatmul.mubr.msk.bf16.gmra.mrb[24].mxu0 %vm114_vm2, %v89_v32  ;;  %703 = vmatmul.mubr.msk.bf16.gmra.mrb[24].mxu1 %vm114_vm2, %v105_v33 }
  0x3d   :  { %674 = vmatprep.mubr.msk.bf16.mxu0 %vm114_vm2, %v90_v34  ;;  %706 = vmatprep.mubr.msk.bf16.mxu1 %vm114_vm2, %v106_v35 }
  0x44   :  { %675 = vmatmul.mubr.msk.bf16.gmra.mrb[28].mxu0 %vm114_vm2, %v91_v40  ;;  %707 = vmatmul.mubr.msk.bf16.gmra.mrb[28].mxu1 %vm114_vm2, %v107_v41 }
  0xdf   :  { %v648_v42 = vpop.f32.mrb[0].mxu0  ;;  %v680_v43 = vpop.f32.mrb[0].mxu1 }
  0xe0   :  { %510 = vst.msk [vmem:[%s1225_s2 + $0x10] sm:$0xff] %vm507_vm3, %v648_v42  ;;  %542 = vst.msk [vmem:[%s1225_s2 + $0x110] sm:$0xff] %vm507_vm3, %v680_v43  ;;  %v252_v44 = vpop.f32.mrb[1].mxu0  ;;  %v380_v45 = vpop.f32.mrb[1].mxu1 }
  0xe1   :  { %508 = vst.msk [vmem:[%s1225_s2] sm:$0xff] %vm507_vm3, %v252_v44  ;;  %540 = vst.msk [vmem:[%s1225_s2 + $0x100] sm:$0xff] %vm507_vm3, %v380_v45  ;;  %v649_v46 = vpop.f32.mrb[2].mxu0  ;;  %v681_v47 = vpop.f32.mrb[2].mxu1 }
  0xe2   :  { %511 = vst.msk [vmem:[%s1225_s2 + $0x18] sm:$0xff] %vm507_vm3, %v649_v46  ;;  %543 = vst.msk [vmem:[%s1225_s2 + $0x118] sm:$0xff] %vm507_vm3, %v681_v47  ;;  %v255_v48 = vpop.f32.mrb[3].mxu0  ;;  %v383_v49 = vpop.f32.mrb[3].mxu1 }
  0xe3   :  { %509 = vst.msk [vmem:[%s1225_s2 + $0x8] sm:$0xff] %vm507_vm3, %v255_v48  ;;  %541 = vst.msk [vmem:[%s1225_s2 + $0x108] sm:$0xff] %vm507_vm3, %v383_v49 }
  0xe7   :  { %v652_v50 = vpop.f32.mrb[4].mxu0  ;;  %v684_v51 = vpop.f32.mrb[4].mxu1 }
  0xe8   :  { %514 = vst.msk [vmem:[%s1225_s2 + $0x30] sm:$0xff] %vm507_vm3, %v652_v50  ;;  %546 = vst.msk [vmem:[%s1225_s2 + $0x130] sm:$0xff] %vm507_vm3, %v684_v51  ;;  %v268_v52 = vpop.f32.mrb[5].mxu0  ;;  %v396_v53 = vpop.f32.mrb[5].mxu1 }
  0xe9   :  { %512 = vst.msk [vmem:[%s1225_s2 + $0x20] sm:$0xff] %vm507_vm3, %v268_v52  ;;  %544 = vst.msk [vmem:[%s1225_s2 + $0x120] sm:$0xff] %vm507_vm3, %v396_v53  ;;  %v653_v54 = vpop.f32.mrb[6].mxu0  ;;  %v685_v55 = vpop.f32.mrb[6].mxu1 }
  0xea   :  { %515 = vst.msk [vmem:[%s1225_s2 + $0x38] sm:$0xff] %vm507_vm3, %v653_v54  ;;  %547 = vst.msk [vmem:[%s1225_s2 + $0x138] sm:$0xff] %vm507_vm3, %v685_v55  ;;  %v271_v56 = vpop.f32.mrb[7].mxu0  ;;  %v399_v57 = vpop.f32.mrb[7].mxu1 }
  0xeb   :  { %513 = vst.msk [vmem:[%s1225_s2 + $0x28] sm:$0xff] %vm507_vm3, %v271_v56  ;;  %545 = vst.msk [vmem:[%s1225_s2 + $0x128] sm:$0xff] %vm507_vm3, %v399_v57 }
  0xef   :  { %v656_v58 = vpop.f32.mrb[8].mxu0  ;;  %v688_v59 = vpop.f32.mrb[8].mxu1 }
  0xf0   :  { %518 = vst.msk [vmem:[%s1225_s2 + $0x50] sm:$0xff] %vm507_vm3, %v656_v58  ;;  %550 = vst.msk [vmem:[%s1225_s2 + $0x150] sm:$0xff] %vm507_vm3, %v688_v59  ;;  %v284_v60 = vpop.f32.mrb[9].mxu0  ;;  %v412_v61 = vpop.f32.mrb[9].mxu1 }
  0xf1   :  { %516 = vst.msk [vmem:[%s1225_s2 + $0x40] sm:$0xff] %vm507_vm3, %v284_v60  ;;  %548 = vst.msk [vmem:[%s1225_s2 + $0x140] sm:$0xff] %vm507_vm3, %v412_v61  ;;  %v657_v62 = vpop.f32.mrb[10].mxu0  ;;  %v689_v63 = vpop.f32.mrb[10].mxu1 }
  0xf2   :  { %519 = vst.msk [vmem:[%s1225_s2 + $0x58] sm:$0xff] %vm507_vm3, %v657_v62  ;;  %551 = vst.msk [vmem:[%s1225_s2 + $0x158] sm:$0xff] %vm507_vm3, %v689_v63  ;;  %v287_v0 = vpop.f32.mrb[11].mxu0  ;;  %v415_v1 = vpop.f32.mrb[11].mxu1 }
  0xf3   :  { %517 = vst.msk [vmem:[%s1225_s2 + $0x48] sm:$0xff] %vm507_vm3, %v287_v0  ;;  %549 = vst.msk [vmem:[%s1225_s2 + $0x148] sm:$0xff] %vm507_vm3, %v415_v1 }
  0xf7   :  { %v660_v2 = vpop.f32.mrb[12].mxu0  ;;  %v692_v3 = vpop.f32.mrb[12].mxu1 }
  0xf8   :  { %522 = vst.msk [vmem:[%s1225_s2 + $0x70] sm:$0xff] %vm507_vm3, %v660_v2  ;;  %554 = vst.msk [vmem:[%s1225_s2 + $0x170] sm:$0xff] %vm507_vm3, %v692_v3  ;;  %v300_v4 = vpop.f32.mrb[13].mxu0  ;;  %v428_v5 = vpop.f32.mrb[13].mxu1 }
  0xf9   :  { %520 = vst.msk [vmem:[%s1225_s2 + $0x60] sm:$0xff] %vm507_vm3, %v300_v4  ;;  %552 = vst.msk [vmem:[%s1225_s2 + $0x160] sm:$0xff] %vm507_vm3, %v428_v5  ;;  %v661_v6 = vpop.f32.mrb[14].mxu0  ;;  %v693_v7 = vpop.f32.mrb[14].mxu1 }
  0xfa   :  { %523 = vst.msk [vmem:[%s1225_s2 + $0x78] sm:$0xff] %vm507_vm3, %v661_v6  ;;  %555 = vst.msk [vmem:[%s1225_s2 + $0x178] sm:$0xff] %vm507_vm3, %v693_v7  ;;  %v303_v8 = vpop.f32.mrb[15].mxu0  ;;  %v431_v9 = vpop.f32.mrb[15].mxu1 }
  0xfb   :  { %521 = vst.msk [vmem:[%s1225_s2 + $0x68] sm:$0xff] %vm507_vm3, %v303_v8  ;;  %553 = vst.msk [vmem:[%s1225_s2 + $0x168] sm:$0xff] %vm507_vm3, %v431_v9 }
  0xff   :  { %v664_v10 = vpop.f32.mrb[16].mxu0  ;;  %v696_v11 = vpop.f32.mrb[16].mxu1 }
 0x100   :  { %526 = vst.msk [vmem:[%s1225_s2 + $0x90] sm:$0xff] %vm507_vm3, %v664_v10  ;;  %558 = vst.msk [vmem:[%s1225_s2 + $0x190] sm:$0xff] %vm507_vm3, %v696_v11  ;;  %v316_v12 = vpop.f32.mrb[17].mxu0  ;;  %v444_v13 = vpop.f32.mrb[17].mxu1 }
 0x101   :  { %524 = vst.msk [vmem:[%s1225_s2 + $0x80] sm:$0xff] %vm507_vm3, %v316_v12  ;;  %556 = vst.msk [vmem:[%s1225_s2 + $0x180] sm:$0xff] %vm507_vm3, %v444_v13  ;;  %v665_v14 = vpop.f32.mrb[18].mxu0  ;;  %v697_v15 = vpop.f32.mrb[18].mxu1 }
 0x102   :  { %527 = vst.msk [vmem:[%s1225_s2 + $0x98] sm:$0xff] %vm507_vm3, %v665_v14  ;;  %559 = vst.msk [vmem:[%s1225_s2 + $0x198] sm:$0xff] %vm507_vm3, %v697_v15  ;;  %v319_v16 = vpop.f32.mrb[19].mxu0  ;;  %v447_v17 = vpop.f32.mrb[19].mxu1 }
 0x103   :  { %525 = vst.msk [vmem:[%s1225_s2 + $0x88] sm:$0xff] %vm507_vm3, %v319_v16  ;;  %557 = vst.msk [vmem:[%s1225_s2 + $0x188] sm:$0xff] %vm507_vm3, %v447_v17 }
 0x107   :  { %v668_v18 = vpop.f32.mrb[20].mxu0  ;;  %v700_v19 = vpop.f32.mrb[20].mxu1 }
 0x108   :  { %530 = vst.msk [vmem:[%s1225_s2 + $0xb0] sm:$0xff] %vm507_vm3, %v668_v18  ;;  %562 = vst.msk [vmem:[%s1225_s2 + $0x1b0] sm:$0xff] %vm507_vm3, %v700_v19  ;;  %v332_v20 = vpop.f32.mrb[21].mxu0  ;;  %v460_v21 = vpop.f32.mrb[21].mxu1 }
 0x109   :  { %528 = vst.msk [vmem:[%s1225_s2 + $0xa0] sm:$0xff] %vm507_vm3, %v332_v20  ;;  %560 = vst.msk [vmem:[%s1225_s2 + $0x1a0] sm:$0xff] %vm507_vm3, %v460_v21  ;;  %v669_v22 = vpop.f32.mrb[22].mxu0  ;;  %v701_v23 = vpop.f32.mrb[22].mxu1 }
 0x10a   :  { %531 = vst.msk [vmem:[%s1225_s2 + $0xb8] sm:$0xff] %vm507_vm3, %v669_v22  ;;  %563 = vst.msk [vmem:[%s1225_s2 + $0x1b8] sm:$0xff] %vm507_vm3, %v701_v23  ;;  %v335_v24 = vpop.f32.mrb[23].mxu0  ;;  %v463_v25 = vpop.f32.mrb[23].mxu1 }
 0x10b   :  { %529 = vst.msk [vmem:[%s1225_s2 + $0xa8] sm:$0xff] %vm507_vm3, %v335_v24  ;;  %561 = vst.msk [vmem:[%s1225_s2 + $0x1a8] sm:$0xff] %vm507_vm3, %v463_v25 }
 0x10f   :  { %v672_v26 = vpop.f32.mrb[24].mxu0  ;;  %v704_v27 = vpop.f32.mrb[24].mxu1 }
 0x110   :  { %534 = vst.msk [vmem:[%s1225_s2 + $0xd0] sm:$0xff] %vm507_vm3, %v672_v26  ;;  %566 = vst.msk [vmem:[%s1225_s2 + $0x1d0] sm:$0xff] %vm507_vm3, %v704_v27  ;;  %v348_v28 = vpop.f32.mrb[25].mxu0  ;;  %v476_v29 = vpop.f32.mrb[25].mxu1 }
 0x111   :  { %532 = vst.msk [vmem:[%s1225_s2 + $0xc0] sm:$0xff] %vm507_vm3, %v348_v28  ;;  %564 = vst.msk [vmem:[%s1225_s2 + $0x1c0] sm:$0xff] %vm507_vm3, %v476_v29  ;;  %v673_v30 = vpop.f32.mrb[26].mxu0  ;;  %v705_v31 = vpop.f32.mrb[26].mxu1 }
 0x112   :  { %535 = vst.msk [vmem:[%s1225_s2 + $0xd8] sm:$0xff] %vm507_vm3, %v673_v30  ;;  %567 = vst.msk [vmem:[%s1225_s2 + $0x1d8] sm:$0xff] %vm507_vm3, %v705_v31  ;;  %v351_v32 = vpop.f32.mrb[27].mxu0  ;;  %v479_v33 = vpop.f32.mrb[27].mxu1 }
 0x113   :  { %533 = vst.msk [vmem:[%s1225_s2 + $0xc8] sm:$0xff] %vm507_vm3, %v351_v32  ;;  %565 = vst.msk [vmem:[%s1225_s2 + $0x1c8] sm:$0xff] %vm507_vm3, %v479_v33 }
 0x117   :  { %v676_v34 = vpop.f32.mrb[28].mxu0  ;;  %v708_v35 = vpop.f32.mrb[28].mxu1 }
 0x118   :  { %538 = vst.msk [vmem:[%s1225_s2 + $0xf0] sm:$0xff] %vm507_vm3, %v676_v34  ;;  %570 = vst.msk [vmem:[%s1225_s2 + $0x1f0] sm:$0xff] %vm507_vm3, %v708_v35  ;;  %v364_v36 = vpop.f32.mrb[29].mxu0  ;;  %v492_v37 = vpop.f32.mrb[29].mxu1 }
 0x119   :  { %536 = vst.msk [vmem:[%s1225_s2 + $0xe0] sm:$0xff] %vm507_vm3, %v364_v36  ;;  %568 = vst.msk [vmem:[%s1225_s2 + $0x1e0] sm:$0xff] %vm507_vm3, %v492_v37  ;;  %v677_v38 = vpop.f32.mrb[30].mxu0  ;;  %v709_v39 = vpop.f32.mrb[30].mxu1 }
 0x11a   :  { %539 = vst.msk [vmem:[%s1225_s2 + $0xf8] sm:$0xff] %vm507_vm3, %v677_v38  ;;  %571 = vst.msk [vmem:[%s1225_s2 + $0x1f8] sm:$0xff] %vm507_vm3, %v709_v39  ;;  %v367_v40 = vpop.f32.mrb[31].mxu0  ;;  %v495_v41 = vpop.f32.mrb[31].mxu1 }
 0x11b   :  { %537 = vst.msk [vmem:[%s1225_s2 + $0xe8] sm:$0xff] %vm507_vm3, %v367_v40  ;;  %569 = vst.msk [vmem:[%s1225_s2 + $0x1e8] sm:$0xff] %vm507_vm3, %v495_v41 }

</bundles_post_ra>
